<compile_context>
chip_gen: v5e
topology: v5e:2x2
jax: 0.10.0
libtpu: 0.0.40
codegen_flags: <defaults>
</compile_context>

<pallas_src>
import numpy as np
import jax
import jax.numpy as jnp
from jax.experimental import pallas as pl
from jax.experimental.pallas import tpu as pltpu

CIN, CF, NUM_CLASSES = 4, 32, 6
K8 = 8  # NUM_CLASSES padded to a full 8-sublane tile


# ---------------------------------------------------------------------------
# Fused Pallas kernel (one grid step per NB images)
# ---------------------------------------------------------------------------

def _fused_seg_kernel(p_ref, wb_ref, wc_ref, up_ref, o_ref):
    # p_ref  : [Cin*9+1, NB*S]  im2col patches + ones row; lanes ordered (n, ho, wo)
    # wb_ref : [Cf+1, Cin*9+1]  backbone weight | bias column, plus the ones-producing row
    # wc_ref : [K8, Cf+1]       1x1 classifier weight | bias column (rows >= 6 are zero)
    # up_ref : [S, H*W]         transposed Kronecker bilinear-interpolation matrix
    # o_ref  : [NB, K8, H*W]    lane-dense (256-wide) output block
    nb, k8, hw = o_ref.shape
    s = up_ref.shape[0]

    # backbone conv + bias (folded) + ReLU; last feature row == 1.0 by construction
    feat = jnp.maximum(
        jnp.dot(wb_ref[...], p_ref[...], preferred_element_type=jnp.float32), 0.0)
    # 1x1 classifier + bias (folded via the ones feature row)
    logits = jnp.dot(wc_ref[...], feat, preferred_element_type=jnp.float32)  # [K8, NB*S]

    # regroup (k, (n, s)) -> ((n, k), s) so the upsample is one MXU-friendly matmul
    if nb > 1:
        logits = jnp.concatenate(
            [logits[:, n * s:(n + 1) * s] for n in range(nb)], axis=0)       # [NB*K8, S]

    out = jnp.dot(logits, up_ref[...], preferred_element_type=jnp.float32)   # [NB*K8, HW]
    o_ref[...] = out.reshape(nb, k8, hw)


# ---------------------------------------------------------------------------
# Host-side glue (trace-time constants + input preprocessing)
# ---------------------------------------------------------------------------

def _im2col_T_batched(x, n_pad):
    """x: [N, C, H, W] -> [C*9 + 1, n_pad*Ho*Wo] for k=3, stride=2, pad=1.

    Rows ordered (c, kh, kw) plus a trailing ones row (for the folded bias);
    columns ordered (n, ho, wo)."""
    N, C, H, W = x.shape
    Ho, Wo = (H + 2 - 3) // 2 + 1, (W + 2 - 3) // 2 + 1
    xp = jnp.pad(x, ((0, 0), (0, 0), (1, 1), (1, 1)))
    taps = [xp[:, :, kh:kh + 2 * Ho:2, kw:kw + 2 * Wo:2]
            for kh in range(3) for kw in range(3)]          # 9 x [N, C, Ho, Wo]
    p = jnp.stack(taps, axis=2)                             # [N, C, 9, Ho, Wo]
    p = p.transpose(1, 2, 0, 3, 4).reshape(C * 9, N * Ho * Wo)
    if n_pad != N:
        p = jnp.pad(p, ((0, 0), (0, (n_pad - N) * Ho * Wo)))
    ones = jnp.ones((1, n_pad * Ho * Wo), p.dtype)
    return jnp.concatenate([p, ones], axis=0), Ho, Wo


def _bilinear_matrix(out_size, in_size):
    """PyTorch F.interpolate(mode='bilinear', align_corners=False) as a numpy
    [out, in] matrix (built at trace time -> compile-time constant)."""
    i = np.arange(out_size, dtype=np.float64)
    scale = in_size / out_size
    src = np.maximum((i + 0.5) * scale - 0.5, 0.0)
    p0 = np.floor(src)
    frac = src - p0
    p0 = np.minimum(p0.astype(np.int64), in_size - 1)
    p1 = np.minimum(p0 + 1, in_size - 1)
    M = np.zeros((out_size, in_size), np.float32)
    rows = np.arange(out_size)
    np.add.at(M, (rows, p0), 1.0 - frac)
    np.add.at(M, (rows, p1), frac)
    return M


def _pick_nb(n):
    """Lane-dense batching: 256 lanes (NB=4) when batch keeps >=2 grid steps (v7x dual
    TC), else 128 lanes (NB=2, also the v5e MXU width), else 1 for a single image."""
    if n >= 8:
        return 4
    if n >= 2:
        return 2
    return 1


# ---------------------------------------------------------------------------
# Model
# ---------------------------------------------------------------------------

def init_params(key):
    k1, k2, k3, k4 = jax.random.split(key, 4)
    w_bb = jax.random.normal(k1, (CF, CIN, 3, 3), jnp.float32) * 0.1          # backbone conv
    b_bb = jax.random.normal(k2, (CF,), jnp.float32) * 0.01
    w_cl = jax.random.normal(k3, (NUM_CLASSES, CF, 1, 1), jnp.float32) * 0.1  # 1x1 classifier
    b_cl = jax.random.normal(k4, (NUM_CLASSES,), jnp.float32) * 0.01
    return {"w_bb": w_bb, "b_bb": b_bb, "w_cl": w_cl, "b_cl": b_cl}


def simple_segmentation_forward(params, x):
    """Equivalent of _SimpleSegmentationModel.forward with aux_classifier=None."""
    N, Cin, H, W = x.shape
    NB = _pick_nb(N)
    n_steps = pl.cdiv(N, NB)
    N_pad = n_steps * NB

    patches, Ho, Wo = _im2col_T_batched(x, N_pad)        # [Cin*9+1, N_pad*S]
    S, HW = Ho * Wo, H * W

    # --- weight packing (trace-time, tiny) ------------------------------------------
    wb = params["w_bb"].reshape(CF, Cin * 9)                                   # [Cf, 36]
    wb_aug = jnp.concatenate([wb, params["b_bb"][:, None]], axis=1)            # [Cf, 37]
    ones_row = jnp.concatenate(
        [jnp.zeros((1, Cin * 9), wb.dtype), jnp.ones((1, 1), wb.dtype)], axis=1)
    wb_aug = jnp.concatenate([wb_aug, ones_row], axis=0)                       # [Cf+1, 37]

    wc = params["w_cl"].reshape(NUM_CLASSES, CF)                               # [6, Cf]
    wc_aug = jnp.concatenate([wc, params["b_cl"][:, None]], axis=1)            # [6, Cf+1]
    wc_pad = jnp.pad(wc_aug, ((0, K8 - NUM_CLASSES), (0, 0)))                  # [K8, Cf+1]

    # Separable bilinear weights -> single Kronecker matrix, transposed so the final
    # matmul yields a lane-dense [NB*K8, HW] tile.
    up_T = jnp.asarray(
        np.kron(_bilinear_matrix(H, Ho), _bilinear_matrix(W, Wo)).T, dtype=jnp.float32)

    flops = 2 * N_pad * S * ((CF + 1) * (Cin * 9 + 1) + K8 * (CF + 1) + K8 * HW)
    bytes_accessed = 4 * (patches.size + wb_aug.size + wc_pad.size + up_T.size
                          + N_pad * K8 * HW)

    out_pad = pl.pallas_call(
        _fused_seg_kernel,
        out_shape=jax.ShapeDtypeStruct((N_pad, K8, HW), jnp.float32),
        grid=(n_steps,),
        in_specs=[
            pl.BlockSpec((Cin * 9 + 1, NB * S), lambda i: (0, i)),   # per-step patches block
            pl.BlockSpec((CF + 1, Cin * 9 + 1), lambda i: (0, 0)),   # resident weights
            pl.BlockSpec((K8, CF + 1), lambda i: (0, 0)),
            pl.BlockSpec((S, HW), lambda i: (0, 0)),                 # resident interp matrix
        ],
        out_specs=pl.BlockSpec((NB, K8, HW), lambda i: (i, 0, 0)),
        compiler_params=pltpu.CompilerParams(
            dimension_semantics=("parallel",),
            allow_input_fusion=[True, False, False, False],
        ),
        cost_estimate=pl.CostEstimate(
            flops=int(flops), transcendentals=0, bytes_accessed=int(bytes_accessed)),
    )(patches, wb_aug, wc_pad, up_T)

    # Drop the 2 padded classes / padded batch entries; NCHW reshape is free.
    out = out_pad[:N, :NUM_CLASSES].reshape(N, NUM_CLASSES, H, W)

    result = {"out": out}
    # TODO(synk): aux_classifier branch omitted (aux_classifier=None in this instantiation).
    return result


# ---------------------------------------------------------------------------
# Pure-JAX reference (independent composition via lax.conv + separable upsample)
# ---------------------------------------------------------------------------

def _reference_forward(params, x):
    N, Cin, H, W = x.shape
    hp = jax.lax.Precision.HIGHEST
    feat = jax.lax.conv_general_dilated(
        x, params["w_bb"], window_strides=(2, 2), padding=((1, 1), (1, 1)),
        dimension_numbers=("NCHW", "OIHW", "NCHW"), precision=hp)
    feat = jax.nn.relu(feat + params["b_bb"][None, :, None, None])
    logits = jax.lax.conv_general_dilated(
        feat, params["w_cl"], window_strides=(1, 1), padding="VALID",
        dimension_numbers=("NCHW", "OIHW", "NCHW"), precision=hp)
    logits = logits + params["b_cl"][None, :, None, None]
    Ho, Wo = logits.shape[-2:]
    wh = jnp.asarray(_bilinear_matrix(H, Ho))
    ww = jnp.asarray(_bilinear_matrix(W, Wo))
    up = jnp.einsum("hp,nkpq->nkhq", wh, logits, precision=hp)
    up = jnp.einsum("wq,nkhq->nkhw", ww, up, precision=hp)
    return up


if __name__ == "__main__":
    key = jax.random.PRNGKey(0)
    pkey, xkey = jax.random.split(key)
    params = init_params(pkey)
    x = jax.random.normal(xkey, (2, CIN, 16, 16), jnp.float32)

    result = jax.jit(simple_segmentation_forward)(params, x)
    out = jax.block_until_ready(result["out"])

    assert out.shape == (2, NUM_CLASSES, 16, 16), out.shape
    assert bool(jnp.all(jnp.isfinite(out)))

    ref = _reference_forward(params, x)
    max_err = float(jnp.max(jnp.abs(out - ref)))
    assert max_err < 1e-2, f"mismatch vs reference: {max_err}"

    print("KERNEL_OK")
</pallas_src>

<mosaic_0001>
module attributes {stable_mosaic.version = 11 : i64} {
  func.func @_fused_seg_kernel(%arg0: i32, %arg1: memref<37x128xf32, #tpu.memory_space<vmem>>, %arg2: memref<33x37xf32, #tpu.memory_space<vmem>>, %arg3: memref<8x33xf32, #tpu.memory_space<vmem>>, %arg4: memref<64x256xf32, #tpu.memory_space<vmem>>, %arg5: memref<2x8x256xf32, #tpu.memory_space<vmem>>) attributes {dimension_semantics = [#tpu.dimension_semantics<parallel>], iteration_bounds = array<i64: 1>, scalar_prefetch = 0 : i64, scratch_operands = 0 : i64, tpu.core_type = #tpu.core_type<tc>, window_params = [{transform_indices = @transform_0, window_bounds = array<i64: 37, 128>}, {pipeline_mode = #tpu.pipeline_mode<synchronous>, transform_indices = @transform_1, window_bounds = array<i64: 33, 37>}, {pipeline_mode = #tpu.pipeline_mode<synchronous>, transform_indices = @transform_2, window_bounds = array<i64: 8, 33>}, {pipeline_mode = #tpu.pipeline_mode<synchronous>, transform_indices = @transform_3, window_bounds = array<i64: 64, 256>}, {transform_indices = @transform_4, window_bounds = array<i64: 2, 8, 256>}]} {
    %c0 = arith.constant 0 : index
    %c0_0 = arith.constant 0 : index
    %0 = vector.load %arg2[%c0, %c0_0] : memref<33x37xf32, #tpu.memory_space<vmem>>, vector<33x37xf32>
    %c0_1 = arith.constant 0 : index
    %c0_2 = arith.constant 0 : index
    %1 = vector.load %arg1[%c0_1, %c0_2] : memref<37x128xf32, #tpu.memory_space<vmem>>, vector<37x128xf32>
    %cst = arith.constant dense<0.000000e+00> : vector<33x128xf32>
    %2 = tpu.matmul %0, %1, %cst {dimension_numbers = #tpu.dot_dimension_numbers<[1], [0], [0], [1], [0, 0, 1, 1], [], []>} : vector<33x37xf32>, vector<37x128xf32>, vector<33x128xf32> -> vector<33x128xf32>
    %cst_3 = arith.constant 0.000000e+00 : f32
    %3 = vector.broadcast %cst_3 : f32 to vector<33x128xf32>
    %4 = arith.maximumf %2, %3 : vector<33x128xf32>
    %c0_4 = arith.constant 0 : index
    %c0_5 = arith.constant 0 : index
    %5 = vector.load %arg3[%c0_4, %c0_5] : memref<8x33xf32, #tpu.memory_space<vmem>>, vector<8x33xf32>
    %cst_6 = arith.constant dense<0.000000e+00> : vector<8x128xf32>
    %6 = tpu.matmul %5, %4, %cst_6 {dimension_numbers = #tpu.dot_dimension_numbers<[1], [0], [0], [1], [0, 0, 1, 1], [], []>} : vector<8x33xf32>, vector<33x128xf32>, vector<8x128xf32> -> vector<8x128xf32>
    %7 = vector.extract_strided_slice %6 {offsets = [0, 0], sizes = [8, 64], strides = [1, 1]} : vector<8x128xf32> to vector<8x64xf32>
    %8 = vector.extract_strided_slice %6 {offsets = [0, 64], sizes = [8, 64], strides = [1, 1]} : vector<8x128xf32> to vector<8x64xf32>
    %9 = tpu.concatenate %7, %8 in 0 : vector<8x64xf32>, vector<8x64xf32> -> vector<16x64xf32>
    %c0_7 = arith.constant 0 : index
    %c0_8 = arith.constant 0 : index
    %10 = vector.load %arg4[%c0_7, %c0_8] : memref<64x256xf32, #tpu.memory_space<vmem>>, vector<64x256xf32>
    %cst_9 = arith.constant dense<0.000000e+00> : vector<16x256xf32>
    %11 = tpu.matmul %9, %10, %cst_9 {dimension_numbers = #tpu.dot_dimension_numbers<[1], [0], [0], [1], [0, 0, 1, 1], [], []>} : vector<16x64xf32>, vector<64x256xf32>, vector<16x256xf32> -> vector<16x256xf32>
    %12 = vector.shape_cast %11 : vector<16x256xf32> to vector<2x8x256xf32>
    %c0_10 = arith.constant 0 : index
    %c0_11 = arith.constant 0 : index
    %c0_12 = arith.constant 0 : index
    %13 = vector.load %arg5[%c0_10, %c0_11, %c0_12] : memref<2x8x256xf32, #tpu.memory_space<vmem>>, vector<2x8x256xf32>
    tpu.vector_store %arg5[%c0_10, %c0_11, %c0_12], %12 {strides = array<i32>} : memref<2x8x256xf32, #tpu.memory_space<vmem>>, vector<2x8x256xf32>,
    return
  }
  func.func @transform_0(%arg0: i32) -> (i32, i32) {
    %c0_i32 = arith.constant 0 : i32
    %c0_i32_0 = arith.constant 0 : i32
    return %c0_i32, %arg0 : i32, i32
  }
  func.func @transform_1(%arg0: i32) -> (i32, i32) {
    %c0_i32 = arith.constant 0 : i32
    %c0_i32_0 = arith.constant 0 : i32
    %c0_i32_1 = arith.constant 0 : i32
    return %c0_i32, %c0_i32_0 : i32, i32
  }
  func.func @transform_2(%arg0: i32) -> (i32, i32) {
    %c0_i32 = arith.constant 0 : i32
    %c0_i32_0 = arith.constant 0 : i32
    %c0_i32_1 = arith.constant 0 : i32
    return %c0_i32, %c0_i32_0 : i32, i32
  }
  func.func @transform_3(%arg0: i32) -> (i32, i32) {
    %c0_i32 = arith.constant 0 : i32
    %c0_i32_0 = arith.constant 0 : i32
    %c0_i32_1 = arith.constant 0 : i32
    return %c0_i32, %c0_i32_0 : i32, i32
  }
  func.func @transform_4(%arg0: i32) -> (i32, i32, i32) {
    %c0_i32 = arith.constant 0 : i32
    %c0_i32_0 = arith.constant 0 : i32
    %c0_i32_1 = arith.constant 0 : i32
    return %arg0, %c0_i32, %c0_i32_0 : i32, i32, i32
  }
}

</mosaic_0001>

<bundles_post_ra>
// kernel: simple_segmentation_forward.2
= control target key start
LH: loop header
LB: loop body
LE: loop exit
PB: predicated region body
PF: predicated region fallthrough
CT: control target
= control target key end

     0   :  { %s395_s0 = inlined_call_operand.vmem [shape: f32[33,37], index: 0, kind: input, shape index: {}]   ;;  %s396_s1 = inlined_call_operand.vmem [shape: f32[8,33], index: 1, kind: input, shape index: {}]   ;;  %s397_s2 = inlined_call_operand.vmem [shape: f32[64,256], index: 2, kind: input, shape index: {}]   ;;  %s398_s3 = inlined_call_operand.vmem [shape: f32[36,128], index: 3, kind: input, shape index: {}]   ;;  %s399_s4 = inlined_call_operand.<no memory space> [shape: f32[], index: 4, kind: input, shape index: {}]   ;;  %s400_s5 = inlined_call_operand.vmem [shape: f32[2,8,256], index: 5, kind: output, shape index: {}]  }
   0x1   :  { %v10_v0 = vstv %s399_s4 }
   0x2   :  { %v63_v1 = vlaneseq  ;;  %v248_v2 = vld [vmem:[%s398_s3 + $0x18] sm:$0xff]  ;;  %v247_v3 = vld [vmem:[%s398_s3 + $0x10] sm:$0xff]  ;;  %v246_v5 = vld [vmem:[%s398_s3 + $0x8] sm:$0xff]  ;;  %vm98_vm1 = vcmask 1044480   ;;  %vm82_vm2 = vcmask 302080   ;;  %vm144_vm3 = vcmask 1040384  }
   0x3   :  { %v19_v6 = vld [vmem:[%s398_s3] sm:$0xff]  ;;  %v75_v12 = vld [vmem:[%s395_s0 + $0x18] sm:$0xff]  ;;  %v73_v13 = vld [vmem:[%s395_s0 + $0x8] sm:$0xff]  ;;  %vm140_vm4 = vcmask 269312   ;;  %vm187_vm5 = vcmask 523264   ;;  %s268_s19 = smov 64  }
   0x4   :  { %v64_v4 = vshrl.u32 %v63_v1, 7  ;;  %v249_v7 = vld [vmem:[%s398_s3 + $0x20] sm:$0xff]  ;;  %v74_v15 = vld [vmem:[%s395_s0 + $0x10] sm:$0xff]  ;;  %v186_v17 = vld [vmem:[%s397_s2 + $0x78] sm:$0xff] }
   0x5   :  { %v72_v11 = vld [vmem:[%s395_s0] sm:$0xff]  ;;  %v185_v16 = vld [vmem:[%s397_s2 + $0x70] sm:$0xff]  ;;  %223 = vmatpush.msra.mxu3 %v186_v17  ;;  %v184_v19 = vld [vmem:[%s397_s2 + $0x68] sm:$0xff] }
   0x6   :  { %v65_v8 = vadd.s32 32, %v64_v4  ;;  %v76_v14 = vld [vmem:[%s395_s0 + $0x20] sm:$0x1]  ;;  %200 = vmatpush.msra.mxu2 %v185_v16  ;;  %v181_v20 = vld [vmem:[%s397_s2 + $0x50] sm:$0xff]  ;;  %v182_v21 = vld [vmem:[%s397_s2 + $0x58] sm:$0xff] }
   0x7   :  { %v183_v18 = vld [vmem:[%s397_s2 + $0x60] sm:$0xff]  ;;  %224 = vmatpush.msra.mxu3 %v184_v19  ;;  %v180_v23 = vld [vmem:[%s397_s2 + $0x48] sm:$0xff]  ;;  %v177_v24 = vld [vmem:[%s397_s2 + $0x30] sm:$0xff] }
   0x8   :  { %vm66_vm0 = vcmp.lt.s32.totalorder %v65_v8, 36  ;;  %201 = vmatpush.msra.mxu2 %v183_v18  ;;  %v179_v22 = vld [vmem:[%s397_s2 + $0x40] sm:$0xff]  ;;  %v178_v25 = vld [vmem:[%s397_s2 + $0x38] sm:$0xff]  ;;  %v176_v29 = vld [vmem:[%s397_s2 + $0x28] sm:$0xff] }
   0x9   :  { %v67_v9 = vsel %vm66_vm0, %v249_v7, %v10_v0  ;;  %225 = vmatpush.msra.mxu3 %v182_v21  ;;  %v175_v28 = vld [vmem:[%s397_s2 + $0x20] sm:$0xff]  ;;  %v173_v30 = vld [vmem:[%s397_s2 + $0x10] sm:$0xff]  ;;  %v174_v31 = vld [vmem:[%s397_s2 + $0x18] sm:$0xff] }
   0xa   :  { %71 = vst [vmem:[#allocation7 + $0x18] sm:$0xff] %v67_v9  ;;  %202 = vmatpush.msra.mxu2 %v181_v20  ;;  %v139_v40 = vld [vmem:[%s396_s1] sm:$0xff]  ;;  %v172_v42 = vld [vmem:[%s397_s2 + $0x8] sm:$0xff] }
   0xb   :  { %226 = vmatpush.msra.mxu3 %v180_v23  ;;  %v171_v41 = vld [vmem:[%s397_s2] sm:$0xff] }
   0xc   :  { %203 = vmatpush.msra.mxu2 %v179_v22 }
   0xd   :  { %227 = vmatpush.msra.mxu3 %v178_v25 }
   0xe   :  { %204 = vmatpush.msra.mxu2 %v177_v24 }
   0xf   :  { %228 = vmatpush.msra.mxu3 %v176_v29 }
  0x10   :  { %205 = vmatpush.msra.mxu2 %v175_v28 }
  0x11   :  { %v81_v10 = vld [vmem:[#allocation7 + $0x18] sm:$0x1f]  ;;  %229 = vmatpush.msra.mxu3 %v174_v31 }
  0x12   :  { %250 = vmatpush.msk.msra.mxu0 %vm98_vm1, %v81_v10  ;;  %262 = vmatpush.msk.msra.mxu1 %vm98_vm1, %v81_v10 }
  0x13   :  { %206 = vmatpush.msra.mxu2 %v173_v30  ;;  %230 = vmatpush.msra.mxu3 %v172_v42 }
  0x14   :  { %114 = vmatpush.msra.mxu0 %v248_v2  ;;  %263 = vmatpush.msra.mxu1 %v248_v2 }
  0x15   :  { %207 = vmatpush.msra.mxu2 %v171_v41 }
  0x16   :  { %115 = vmatpush.msra.mxu0 %v247_v3  ;;  %264 = vmatpush.msra.mxu1 %v247_v3 }
  0x18   :  { %116 = vmatpush.msra.mxu0 %v246_v5  ;;  %265 = vmatpush.msra.mxu1 %v246_v5 }
  0x1a   :  { %117 = vmatpush.msra.mxu0 %v19_v6  ;;  %266 = vmatpush.msra.mxu1 %v19_v6 }
  0x1b   :  { %251 = vmatmul.msk.f32.vlgmr.msra.gmra.mxu0 %vm82_vm2, %v72_v11  ;;  %254 = vmatmul.msk.f32.vlgmr.msra.gmra.mxu1 %vm82_vm2, %v75_v12 }
  0x23   :  { %252 = vmatmul.msk.f32.gmra.mxu0 %vm82_vm2, %v73_v13  ;;  %255 = vmatmul.msk.f32.gmra.mxu1 %vm82_vm2, %v76_v14 }
  0x2b   :  { %253 = vmatmul.msk.f32.gmra.mxu0 %vm82_vm2, %v74_v15 }
  0x98   :  { %v119_v26 = vpop.f32.mrf.mxu0  ;;  %v128_v27 = vpop.f32.mrf.mxu1 }
  0x99   :  { %v137_v35 = vmax.f32 %v128_v27, 0.0  ;;  %v134_v39 = vmax.f32 %v119_v26, 0.0 }
  0xa0   :  { %v122_v32 = vpop.f32.mrf.mxu0  ;;  %v131_v33 = vpop.f32.mrf.mxu1 }
  0xa1   :  { %v138_v34 = vmax.f32 %v131_v33, 0.0  ;;  %v135_v38 = vmax.f32 %v122_v32, 0.0 }
  0xa3   :  { %256 = vmatpush.msk.msrb.mxu1 %vm144_vm3, %v138_v34 }
  0xa5   :  { %160 = vmatpush.msrb.mxu1 %v137_v35 }
  0xa8   :  { %v125_v36 = vpop.f32.mrf.mxu0 }
  0xa9   :  { %v136_v37 = vmax.f32 %v125_v36, 0.0 }
  0xab   :  { %161 = vmatpush.msrb.mxu1 %v136_v37 }
  0xad   :  { %162 = vmatpush.msrb.mxu1 %v135_v38 }
  0xaf   :  { %163 = vmatpush.msrb.mxu1 %v134_v39 }
  0xb0   :  { %257 = vmatmul.msk.f32.vlgmr.msrb.gmra.mxu1 %vm140_vm4, %v139_v40 }
 0x12d   :  { %v165_v43 = vpop.f32.mrf.mxu1 }
 0x12e   :  { %169 = vrot.lane.b32.xlu0 %v165_v43, %s268_s19  ;;  %258 = vmatmul.msk.f32.vlgmr.msra.gmra.mxu2 %vm187_vm5, %v165_v43 }
 0x12f   :  { %260 = vmatmul.msk.f32.vlgmr.msra.gmra.mxu3 %vm187_vm5, %v165_v43 }
 0x1a0   :  { %v170_v44 = vpop.permute.xlu0 %169 }
 0x1a1   :  { %259 = vmatmul.msk.f32.gmra.mxu2 %vm187_vm5, %v170_v44  ;;  %261 = vmatmul.msk.f32.gmra.mxu3 %vm187_vm5, %v170_v44 }
 0x1b1   :  { %v209_v45 = vpop.f32.mrf.mxu2 }
 0x1b2   :  { %238 = vst [vmem:[%s400_s5] sm:$0xff] %v209_v45  ;;  %v232_v46 = vpop.f32.mrf.mxu3 }
 0x1b3   :  { %239 = vst [vmem:[%s400_s5 + $0x8] sm:$0xff] %v232_v46 }
 0x224   :  { %v212_v47 = vpop.f32.mrf.mxu2  ;;  %v235_v48 = vpop.f32.mrf.mxu3 }
 0x225   :  { %240 = vst [vmem:[%s400_s5 + $0x10] sm:$0xff] %v212_v47 }
 0x226   :  { %241 = vst [vmem:[%s400_s5 + $0x18] sm:$0xff] %v235_v48 }

</bundles_post_ra>
